<compile_context>
chip_gen: v5e
topology: v5e:2x2
jax: 0.10.0
libtpu: 0.0.40
codegen_flags: <defaults>
</compile_context>

<pallas_src>
from math import sqrt, log, pi

import jax
import jax.numpy as jnp
from jax.experimental import pallas as pl
from jax.experimental.pallas import tpu as pltpu
from jax.scipy.special import gammaln, digamma

# ---------------- model hyperparameters (small, consistent with the module) ---
B = 8                     # batch
C, H, W_IMG = 1, 8, 8
NX = C * H * W_IMG        # 64
NH = 32                   # nh = nhq = nhp
NZ = 16
NW = 8
NCLASSES = 4
DSCALE = 1.0
WSCALE = 1.0
YSCALE = 1.0
ZSCALE = 1.0
CONCENTRATION = 0.5
EPS = 1e-8
NEG_SLOPE = 0.01                      # LeakyReLU default
BN_SCALE = 1.0 / sqrt(1.0 + 1e-5)     # eval-mode BatchNorm1d, default running stats
HALF_LOG_2PI = 0.5 * log(2.0 * pi)

LANES = 128
NWZ = NW + NZ                         # 24

# ---------------- weight slab row layout (all blocks 16-row aligned, bf16) ----
R_XA = 0       # K=64 : x -> [qwz_h1 (0:32) | qy_h1_xpart (32:64) | qd_h1_xpart (64:96)]
R_QWZ2 = 64    # K=32 : Qwz layer 2
R_QWZ3 = 96    # K=32 : Qwz head -> 48 cols
R_SB = 128     # K=32 : s=[w|z|pad] -> [qy_s (0:32) | qd_s (32:64) | px1 (64:96) | pz1 (96:128)]
R_QYD2 = 160   # K=64 : Qy|Qd layer 2 (block diagonal)
R_QYD3 = 224   # K=64 : Qy|Qd heads   (block diagonal, 8 cols)
R_PXZ2 = 288   # K=64 : Px|Pz layer 2 (block diagonal)
R_PX3 = 352    # K=32 : Px head -> 64 cols
R_PZ3 = 384    # K=32 : Pz head -> 128 cols (mu-major reorder)
R_BIAS = 416   # 16 rows: layer biases + folded logsigma_x constants
SLAB_ROWS = 432

# bias row indices (relative to R_BIAS)
BI_XA, BI_QWZ2, BI_QWZ3, BI_SB, BI_QYD2, BI_QYD3, BI_PXZ2, BI_PX3, BI_PZ3 = range(9)
BI_LS = 9      # soft-clipped logsigma_x
BI_IVM1 = 10   # exp(-2*logsigma_x) - 1  (delta-from-1 keeps bf16 precision)

# ---------------- packed output column layout ---------------------------------
O_WZ = 0          # 48: [mu_w | mu_z | logvar_w | logvar_z]
O_S = 48          # 24: sampled [w | z]
O_QY = 72         # 4
O_DL = 76         # 4
O_LOSS = 80       # 4: [loss_rec_i | loss_z_i | loss_w_i | loss_y_i]
O_REC = 128       # 128 (first NX live)
O_ZW = 256        # 128: [mu_z_w (class-major) | logvar_z_w (class-major)]
OUT_COLS = 384


# =============================== fused Pallas kernel ===========================
def fused_kernel(xn_ref, w_ref, out_ref):
    def lrelu(h):
        return jnp.where(h > 0, h, NEG_SLOPE * h)

    def mm(h, r0, k):
        # bf16 x bf16 -> f32 on the MXU (matches default TPU matmul precision)
        return jnp.dot(h.astype(jnp.bfloat16), w_ref[r0:r0 + k, :],
                       preferred_element_type=jnp.float32)

    bias = w_ref[R_BIAS:R_BIAS + 16, :].astype(jnp.float32)   # (16,128)

    def brow(i):
        return bias[i:i + 1, :]

    xn = xn_ref[...]                    # (B,128) = [x | noise_w | noise_z | 0]
    x = xn[:, 0:NX]
    noise = xn[:, NX:NX + NWZ]

    # ---- Qwz layer 1 merged with Qy/Qd layer-1 x-projection (shared LHS x) ---
    h0 = mm(x, R_XA, NX) + brow(BI_XA)                   # (B,128)
    h_qwz = lrelu(h0[:, 0:NH])                           # Qwz hidden 1
    xproj = h0[:, NH:3 * NH]                             # Qy|Qd layer-1 x-part (+bias)

    # ---- Qwz layer 2 + head ---------------------------------------------------
    h1 = lrelu(mm(h_qwz, R_QWZ2, NH) + brow(BI_QWZ2))
    wz_full = mm(h1[:, 0:NH], R_QWZ3, NH) + brow(BI_QWZ3)
    wz48 = wz_full[:, 0:2 * NWZ]

    # ---- reparameterize: sampled [w | z] --------------------------------------
    mu = wz_full[:, 0:NWZ]
    lv = wz_full[:, NWZ:2 * NWZ]
    s = mu + noise * jnp.exp(0.5 * lv)                   # (B,24)
    s32 = jnp.concatenate([s, jnp.zeros((B, 32 - NWZ), jnp.float32)], axis=-1)

    # ---- merged s-projection: Qy|Qd layer-1 s-part + Px|Pz layer-1 ------------
    sproj = mm(s32, R_SB, 32) + brow(BI_SB)
    g = lrelu(sproj[:, 0:2 * NH] + xproj)                # Qy|Qd hidden 1 (B,64)
    ph = lrelu(sproj[:, 2 * NH:4 * NH])                  # Px|Pz hidden 1 (B,64)

    # ---- Qy|Qd layers 2/3 (block diagonal) ------------------------------------
    g2 = lrelu(mm(g, R_QYD2, 2 * NH) + brow(BI_QYD2))
    logits = mm(g2[:, 0:2 * NH], R_QYD3, 2 * NH) + brow(BI_QYD3)
    qy_logits = logits[:, 0:NCLASSES]
    d_logits = logits[:, NCLASSES:2 * NCLASSES]

    m = jnp.max(qy_logits, axis=-1, keepdims=True)
    e = jnp.exp(qy_logits - m)
    q_y = e / jnp.sum(e, axis=-1, keepdims=True)         # exact divide (8x4 only)
    q_y = EPS / NCLASSES + (1.0 - EPS) * q_y

    # ---- Px|Pz layers 2/3 -----------------------------------------------------
    ph2 = lrelu(mm(ph, R_PXZ2, 2 * NH) + brow(BI_PXZ2))
    rec_full = mm(ph2[:, 0:NH], R_PX3, NH) + brow(BI_PX3)       # cols 0:NX live
    zw_full = mm(ph2[:, NH:2 * NH], R_PZ3, NH) + brow(BI_PZ3)   # [mu-major | lv-major]

    # ---- per-sample losses ----------------------------------------------------
    # loss_rec (Gauss) with constant-folded soft-clipped logsigma_x
    ls = bias[BI_LS:BI_LS + 1, 0:NX]
    inv_var = 1.0 + bias[BI_IVM1:BI_IVM1 + 1, 0:NX]      # exp(-2*ls)
    rec = rec_full[:, 0:NX]
    lrec = jnp.sum(0.5 * (x - rec) ** 2 * inv_var + ls + HALF_LOG_2PI,
                   axis=-1, keepdims=True)

    # loss_w : KL(N(mu_w, var_w) || N(0, 1)) summed over nw
    mu_w = wz_full[:, 0:NW]
    lv_w = wz_full[:, NWZ:NWZ + NW]
    lw = WSCALE * jnp.sum(-0.5 * (1.0 + lv_w - mu_w * mu_w - jnp.exp(lv_w)),
                          axis=-1, keepdims=True)

    # loss_z : sum_c q_y[:,c] * KL(N(mu_z,var_z) || N(mu_z_w[c],var_z_w[c]))
    mu_z = wz_full[:, NW:NWZ]
    lv_z = wz_full[:, NWZ + NW:2 * NWZ]
    mu_z_t = jnp.concatenate([mu_z] * NCLASSES, axis=-1)       # (B,64)
    lv_z_t = jnp.concatenate([lv_z] * NCLASSES, axis=-1)
    mu2 = zw_full[:, 0:NCLASSES * NZ]
    lv2 = zw_full[:, NCLASSES * NZ:2 * NCLASSES * NZ]
    kld = 0.5 * (-1.0 + lv2 - lv_z_t
                 + (jnp.exp(lv_z_t) + (mu_z_t - mu2) ** 2) * jnp.exp(-lv2))
    kmat = jnp.concatenate(
        [jnp.sum(kld[:, c * NZ:(c + 1) * NZ], axis=-1, keepdims=True)
         for c in range(NCLASSES)], axis=-1)                   # (B,4), full f32
    lz = ZSCALE * jnp.sum(q_y * kmat, axis=-1, keepdims=True)

    # loss_y : -max(q_y)
    ly = -jnp.max(q_y, axis=-1, keepdims=True)

    # ---- single fully lane-dense (B,384) store --------------------------------
    pad = jnp.zeros((B, LANES - (2 * NWZ + NWZ + 2 * NCLASSES + 4)), jnp.float32)
    blk0 = jnp.concatenate([wz48, s, q_y, d_logits, lrec, lz, lw, ly, pad], axis=-1)
    out_ref[...] = jnp.concatenate([blk0, rec_full, zw_full], axis=-1)


# =============================== parameter setup ===============================
def init_params(key):
    """Deterministic synthetic init (torch nn.Linear style uniform)."""
    def linear(k, fan_in, fan_out):
        kw, kb = jax.random.split(k)
        lim = 1.0 / sqrt(fan_in)
        w = jax.random.uniform(kw, (fan_in, fan_out), jnp.float32, -lim, lim)
        b = jax.random.uniform(kb, (fan_out,), jnp.float32, -lim, lim)
        return w, b

    keys = jax.random.split(key, 16)
    p = {}
    p['qwz_w1'], p['qwz_b1'] = linear(keys[0], NX, NH)
    p['qwz_w2'], p['qwz_b2'] = linear(keys[1], NH, NH)
    p['qwz_w3'], p['qwz_b3'] = linear(keys[2], NH, 2 * NWZ)
    p['qy_w1'], p['qy_b1'] = linear(keys[3], NWZ + NX, NH)   # cat order [w|z|x]
    p['qy_w2'], p['qy_b2'] = linear(keys[4], NH, NH)
    p['qy_w3'], p['qy_b3'] = linear(keys[5], NH, NCLASSES)
    p['qd_w1'], p['qd_b1'] = linear(keys[6], NWZ + NX, NH)
    p['qd_w2'], p['qd_b2'] = linear(keys[7], NH, NH)
    p['qd_w3'], p['qd_b3'] = linear(keys[8], NH, NCLASSES)
    p['px_w1'], p['px_b1'] = linear(keys[9], NZ, NH)
    p['px_w2'], p['px_b2'] = linear(keys[10], NH, NH)
    p['px_w3'], p['px_b3'] = linear(keys[11], NH, NX)
    p['pz_w1'], p['pz_b1'] = linear(keys[12], NW, NH)
    p['pz_w2'], p['pz_b2'] = linear(keys[13], NH, NH)
    p['pz_w3'], p['pz_b3'] = linear(keys[14], NH, 2 * NCLASSES * NZ)
    p['logsigma_x'] = jnp.zeros((NX,), jnp.float32)          # module parameter
    return p


def softclip(t, lo, hi):
    t = lo + jax.nn.softplus(t - lo)
    t = hi - jax.nn.softplus(hi - t)
    return t


def pack_params(p):
    """Pack all parameters (+ folded constants) into one bf16 slab."""
    s = BN_SCALE
    W = jnp.zeros((SLAB_ROWS, LANES), jnp.float32)

    # --- x-block: Qwz layer1 + Qy/Qd layer1 x-part (BN scale folded) ---
    W = W.at[R_XA:R_XA + NX, 0:NH].set(p['qwz_w1'] * s)
    W = W.at[R_XA:R_XA + NX, NH:2 * NH].set(p['qy_w1'][NWZ:] * s)
    W = W.at[R_XA:R_XA + NX, 2 * NH:3 * NH].set(p['qd_w1'][NWZ:] * s)
    # --- Qwz layer 2 / head ---
    W = W.at[R_QWZ2:R_QWZ2 + NH, 0:NH].set(p['qwz_w2'] * s)
    W = W.at[R_QWZ3:R_QWZ3 + NH, 0:2 * NWZ].set(p['qwz_w3'])
    # --- s-block: rows 0:NW = w dims, NW:NWZ = z dims ---
    W = W.at[R_SB:R_SB + NW, 0:NH].set(p['qy_w1'][0:NW] * s)
    W = W.at[R_SB:R_SB + NW, NH:2 * NH].set(p['qd_w1'][0:NW] * s)
    W = W.at[R_SB:R_SB + NW, 3 * NH:4 * NH].set(p['pz_w1'] * s)     # Pz reads w
    W = W.at[R_SB + NW:R_SB + NWZ, 0:NH].set(p['qy_w1'][NW:NWZ] * s)
    W = W.at[R_SB + NW:R_SB + NWZ, NH:2 * NH].set(p['qd_w1'][NW:NWZ] * s)
    W = W.at[R_SB + NW:R_SB + NWZ, 2 * NH:3 * NH].set(p['px_w1'] * s)  # Px reads z
    # --- Qy|Qd layer 2 (block diagonal) + heads ---
    W = W.at[R_QYD2:R_QYD2 + NH, 0:NH].set(p['qy_w2'] * s)
    W = W.at[R_QYD2 + NH:R_QYD2 + 2 * NH, NH:2 * NH].set(p['qd_w2'] * s)
    W = W.at[R_QYD3:R_QYD3 + NH, 0:NCLASSES].set(p['qy_w3'])
    W = W.at[R_QYD3 + NH:R_QYD3 + 2 * NH, NCLASSES:2 * NCLASSES].set(p['qd_w3'])
    # --- Px|Pz layer 2 (block diagonal) + heads ---
    W = W.at[R_PXZ2:R_PXZ2 + NH, 0:NH].set(p['px_w2'] * s)
    W = W.at[R_PXZ2 + NH:R_PXZ2 + 2 * NH, NH:2 * NH].set(p['pz_w2'] * s)
    W = W.at[R_PX3:R_PX3 + NH, 0:NX].set(p['px_w3'])
    # Pz head columns reordered to mu-major so the kernel slices [mu | logvar]
    perm = jnp.asarray(
        [c * 2 * NZ + j for c in range(NCLASSES) for j in range(NZ)]
        + [c * 2 * NZ + NZ + j for c in range(NCLASSES) for j in range(NZ)],
        jnp.int32)
    W = W.at[R_PZ3:R_PZ3 + NH, 0:2 * NCLASSES * NZ].set(p['pz_w3'][:, perm])

    # --- bias / constant rows ---
    def bset(Warr, row, col, vec):
        return Warr.at[R_BIAS + row, col:col + vec.shape[0]].set(vec)

    W = bset(W, BI_XA, 0, p['qwz_b1'] * s)
    W = bset(W, BI_XA, NH, p['qy_b1'] * s)
    W = bset(W, BI_XA, 2 * NH, p['qd_b1'] * s)
    W = bset(W, BI_QWZ2, 0, p['qwz_b2'] * s)
    W = bset(W, BI_QWZ3, 0, p['qwz_b3'])
    W = bset(W, BI_SB, 2 * NH, p['px_b1'] * s)
    W = bset(W, BI_SB, 3 * NH, p['pz_b1'] * s)
    W = bset(W, BI_QYD2, 0, p['qy_b2'] * s)
    W = bset(W, BI_QYD2, NH, p['qd_b2'] * s)
    W = bset(W, BI_QYD3, 0, p['qy_b3'])
    W = bset(W, BI_QYD3, NCLASSES, p['qd_b3'])
    W = bset(W, BI_PXZ2, 0, p['px_b2'] * s)
    W = bset(W, BI_PXZ2, NH, p['pz_b2'] * s)
    W = bset(W, BI_PX3, 0, p['px_b3'])
    W = bset(W, BI_PZ3, 0, p['pz_b3'][perm])

    # --- constant-folded soft-clipped logsigma_x (parameter-only function) ---
    ls = softclip(p['logsigma_x'], -8.0, 8.0)
    W = bset(W, BI_LS, 0, ls)
    W = bset(W, BI_IVM1, 0, jnp.exp(-2.0 * ls) - 1.0)

    return W.astype(jnp.bfloat16)


# =============================== glue / wrapper ================================
def forward(w_slab, inp, key):
    x = inp.reshape(B, NX).astype(jnp.float32)            # nn.Flatten()

    k_nw, k_nz, k_dir = jax.random.split(key, 3)
    noise = jnp.concatenate(
        [jax.random.normal(k_nw, (B, NW), jnp.float32),
         jax.random.normal(k_nz, (B, NZ), jnp.float32)], axis=-1)
    xn = jnp.concatenate(
        [x, noise, jnp.zeros((B, LANES - NX - NWZ), jnp.float32)], axis=-1)

    cost = pl.CostEstimate(
        flops=2 * B * LANES * (NX + NH + NH + 32 + 64 + 64 + 64 + NH + NH),
        transcendentals=1500,
        bytes_accessed=SLAB_ROWS * LANES * 2 + B * LANES * 4 + B * OUT_COLS * 4)

    packed = pl.pallas_call(
        fused_kernel,
        out_shape=jax.ShapeDtypeStruct((B, OUT_COLS), jnp.float32),
        in_specs=[pl.BlockSpec(memory_space=pltpu.MemorySpace.VMEM),
                  pl.BlockSpec(memory_space=pltpu.MemorySpace.VMEM)],
        out_specs=pl.BlockSpec(memory_space=pltpu.MemorySpace.VMEM),
        cost_estimate=cost,
    )(xn, w_slab)

    # ---- unpack the lane-dense output slab ----
    wz_flat = packed[:, O_WZ:O_WZ + 2 * NWZ]
    w = packed[:, O_S:O_S + NW]
    z = packed[:, O_S + NW:O_S + NWZ]
    q_y = packed[:, O_QY:O_QY + NCLASSES]
    d_logits = packed[:, O_DL:O_DL + NCLASSES]
    lrec_i = packed[:, O_LOSS]
    lz_i = packed[:, O_LOSS + 1]
    lw_i = packed[:, O_LOSS + 2]
    ly_i = packed[:, O_LOSS + 3]
    rec = packed[:, O_REC:O_REC + NX]
    zw = packed[:, O_ZW:O_ZW + 2 * NCLASSES * NZ]

    wz = wz_flat.reshape(B, 2, NWZ)                        # nn.Unflatten(1,(2,nz+nw))
    mu_w = wz_flat[:, :NW]
    mu_z = wz_flat[:, NW:NWZ]
    logvar_w = wz_flat[:, NWZ:NWZ + NW]
    logvar_z = wz_flat[:, NWZ + NW:]
    mu_z_w = zw[:, :NCLASSES * NZ].reshape(B, NCLASSES, NZ)
    logvar_z_w = zw[:, NCLASSES * NZ:].reshape(B, NCLASSES, NZ)

    # p_y = Dirichlet(exp(d_logits)).rsample()   (gamma rejection sampling: JAX glue)
    # clip is a pure numerical guard against exp overflow -> NaN in the sampler;
    # identical to the module at normal logit magnitudes.
    alpha = jnp.exp(jnp.clip(d_logits, -30.0, 30.0))
    p_y = jax.random.dirichlet(k_dir, alpha)
    p_y = EPS / NCLASSES + (1.0 - EPS) * p_y

    loss_rec = jnp.mean(lrec_i)
    loss_z = jnp.mean(lz_i)
    loss_w = jnp.mean(lw_i)
    loss_y = jnp.mean(ly_i)
    loss_y_alt = YSCALE * jnp.mean(
        jnp.sum(q_y * (jnp.log(q_y) - jnp.log(p_y)), axis=-1))
    loss_y_alt2 = jnp.float32(0.0)

    # loss_d : KL(Dirichlet(alpha) || Dirichlet(concentration)) (lgamma/digamma glue)
    beta = jnp.full((B, NCLASSES), CONCENTRATION, jnp.float32)
    a0 = jnp.sum(alpha, axis=-1)
    b0 = jnp.sum(beta, axis=-1)
    kl_dir = (gammaln(a0) - jnp.sum(gammaln(alpha), axis=-1)
              - gammaln(b0) + jnp.sum(gammaln(beta), axis=-1)
              + jnp.sum((alpha - beta) * (digamma(alpha) - digamma(a0)[:, None]),
                        axis=-1))
    loss_d = DSCALE * jnp.mean(kl_dir)

    total_loss = loss_rec + loss_z + loss_w + loss_d + loss_y_alt + loss_y_alt2
    num_clusters = jnp.sum(jnp.sum(jnp.where(q_y > 0.5, q_y, 0.0), axis=0) > 0)

    losses = dict(rec=loss_rec, loss_z=loss_z, loss_w=loss_w, loss_y=loss_y,
                  loss_d=loss_d, loss_y_alt=loss_y_alt, loss_y_alt2=loss_y_alt2,
                  total_loss=total_loss, num_clusters=num_clusters)
    output = dict(wz=wz, mu_w=mu_w, mu_z=mu_z, logvar_w=logvar_w,
                  logvar_z=logvar_z, w=w, z=z, q_y=q_y, d_logits=d_logits,
                  rec=rec, mu_z_w=mu_z_w, logvar_z_w=logvar_z_w, p_y=p_y,
                  losses=losses)
    return output


if __name__ == "__main__":
    root = jax.random.PRNGKey(0)
    k_param, k_input, k_noise = jax.random.split(root, 3)
    params = init_params(k_param)
    w_slab = pack_params(params)                           # pack once, reuse per call
    inp = jax.random.normal(k_input, (B, C, H, W_IMG), jnp.float32)   # NCHW
    fwd = jax.jit(forward)
    out = fwd(w_slab, inp, k_noise)
    jax.block_until_ready(out)
    print("KERNEL_OK")
</pallas_src>

<mosaic_0001>
module attributes {stable_mosaic.version = 11 : i64} {
  func.func @fused_kernel(%arg0: memref<8x128xf32, #tpu.memory_space<vmem>>, %arg1: memref<432x128xbf16, #tpu.memory_space<vmem>>, %arg2: memref<8x384xf32, #tpu.memory_space<vmem>>) attributes {dimension_semantics = [], scalar_prefetch = 0 : i64, scratch_operands = 0 : i64, tpu.core_type = #tpu.core_type<tc>} {
    %c416 = arith.constant 416 : index
    %c0 = arith.constant 0 : index
    %0 = vector.load %arg1[%c416, %c0] : memref<432x128xbf16, #tpu.memory_space<vmem>>, vector<16x128xbf16>
    %1 = arith.extf %0 : vector<16x128xbf16> to vector<16x128xf32>
    %c0_0 = arith.constant 0 : index
    %c0_1 = arith.constant 0 : index
    %2 = vector.load %arg0[%c0_0, %c0_1] : memref<8x128xf32, #tpu.memory_space<vmem>>, vector<8x128xf32>
    %3 = vector.extract_strided_slice %2 {offsets = [0, 0], sizes = [8, 64], strides = [1, 1]} : vector<8x128xf32> to vector<8x64xf32>
    %4 = vector.extract_strided_slice %2 {offsets = [0, 64], sizes = [8, 24], strides = [1, 1]} : vector<8x128xf32> to vector<8x24xf32>
    %5 = arith.truncf %3 : vector<8x64xf32> to vector<8x64xbf16>
    %c0_2 = arith.constant 0 : index
    %c0_3 = arith.constant 0 : index
    %6 = vector.load %arg1[%c0_2, %c0_3] : memref<432x128xbf16, #tpu.memory_space<vmem>>, vector<64x128xbf16>
    %cst = arith.constant dense<0.000000e+00> : vector<8x128xf32>
    %7 = tpu.matmul %5, %6, %cst {dimension_numbers = #tpu.dot_dimension_numbers<[1], [0], [0], [1], [0, 0, 1, 1], [], []>} : vector<8x64xbf16>, vector<64x128xbf16>, vector<8x128xf32> -> vector<8x128xf32>
    %8 = vector.extract_strided_slice %1 {offsets = [0, 0], sizes = [1, 128], strides = [1, 1]} : vector<16x128xf32> to vector<1x128xf32>
    %9 = vector.broadcast %8 : vector<1x128xf32> to vector<8x128xf32>
    %10 = arith.addf %7, %9 : vector<8x128xf32>
    %11 = vector.extract_strided_slice %10 {offsets = [0, 0], sizes = [8, 32], strides = [1, 1]} : vector<8x128xf32> to vector<8x32xf32>
    %cst_4 = arith.constant 0.000000e+00 : f32
    %12 = vector.broadcast %cst_4 : f32 to vector<8x32xf32>
    %13 = arith.cmpf ogt, %11, %12 : vector<8x32xf32>
    %cst_5 = arith.constant 0.00999999977 : f32
    %14 = vector.broadcast %cst_5 : f32 to vector<8x32xf32>
    %15 = arith.mulf %14, %11 : vector<8x32xf32>
    %16 = arith.select %13, %11, %15 : vector<8x32xi1>, vector<8x32xf32>
    %17 = vector.extract_strided_slice %10 {offsets = [0, 32], sizes = [8, 64], strides = [1, 1]} : vector<8x128xf32> to vector<8x64xf32>
    %18 = arith.truncf %16 : vector<8x32xf32> to vector<8x32xbf16>
    %c64 = arith.constant 64 : index
    %c0_6 = arith.constant 0 : index
    %19 = vector.load %arg1[%c64, %c0_6] : memref<432x128xbf16, #tpu.memory_space<vmem>>, vector<32x128xbf16>
    %cst_7 = arith.constant dense<0.000000e+00> : vector<8x128xf32>
    %20 = tpu.matmul %18, %19, %cst_7 {dimension_numbers = #tpu.dot_dimension_numbers<[1], [0], [0], [1], [0, 0, 1, 1], [], []>} : vector<8x32xbf16>, vector<32x128xbf16>, vector<8x128xf32> -> vector<8x128xf32>
    %21 = vector.extract_strided_slice %1 {offsets = [1, 0], sizes = [1, 128], strides = [1, 1]} : vector<16x128xf32> to vector<1x128xf32>
    %22 = vector.broadcast %21 : vector<1x128xf32> to vector<8x128xf32>
    %23 = arith.addf %20, %22 : vector<8x128xf32>
    %cst_8 = arith.constant 0.000000e+00 : f32
    %24 = vector.broadcast %cst_8 : f32 to vector<8x128xf32>
    %25 = arith.cmpf ogt, %23, %24 : vector<8x128xf32>
    %cst_9 = arith.constant 0.00999999977 : f32
    %26 = vector.broadcast %cst_9 : f32 to vector<8x128xf32>
    %27 = arith.mulf %26, %23 : vector<8x128xf32>
    %28 = arith.select %25, %23, %27 : vector<8x128xi1>, vector<8x128xf32>
    %29 = vector.extract_strided_slice %28 {offsets = [0, 0], sizes = [8, 32], strides = [1, 1]} : vector<8x128xf32> to vector<8x32xf32>
    %30 = arith.truncf %29 : vector<8x32xf32> to vector<8x32xbf16>
    %c96 = arith.constant 96 : index
    %c0_10 = arith.constant 0 : index
    %31 = vector.load %arg1[%c96, %c0_10] : memref<432x128xbf16, #tpu.memory_space<vmem>>, vector<32x128xbf16>
    %cst_11 = arith.constant dense<0.000000e+00> : vector<8x128xf32>
    %32 = tpu.matmul %30, %31, %cst_11 {dimension_numbers = #tpu.dot_dimension_numbers<[1], [0], [0], [1], [0, 0, 1, 1], [], []>} : vector<8x32xbf16>, vector<32x128xbf16>, vector<8x128xf32> -> vector<8x128xf32>
    %33 = vector.extract_strided_slice %1 {offsets = [2, 0], sizes = [1, 128], strides = [1, 1]} : vector<16x128xf32> to vector<1x128xf32>
    %34 = vector.broadcast %33 : vector<1x128xf32> to vector<8x128xf32>
    %35 = arith.addf %32, %34 : vector<8x128xf32>
    %36 = vector.extract_strided_slice %35 {offsets = [0, 0], sizes = [8, 48], strides = [1, 1]} : vector<8x128xf32> to vector<8x48xf32>
    %37 = vector.extract_strided_slice %35 {offsets = [0, 0], sizes = [8, 24], strides = [1, 1]} : vector<8x128xf32> to vector<8x24xf32>
    %38 = vector.extract_strided_slice %35 {offsets = [0, 24], sizes = [8, 24], strides = [1, 1]} : vector<8x128xf32> to vector<8x24xf32>
    %cst_12 = arith.constant 5.000000e-01 : f32
    %39 = vector.broadcast %cst_12 : f32 to vector<8x24xf32>
    %40 = arith.mulf %39, %38 : vector<8x24xf32>
    %41 = math.exp %40 : vector<8x24xf32>
    %42 = arith.mulf %4, %41 : vector<8x24xf32>
    %43 = arith.addf %37, %42 : vector<8x24xf32>
    %cst_13 = arith.constant 0.000000e+00 : f32
    %44 = vector.broadcast %cst_13 : f32 to vector<8x8xf32>
    %45 = tpu.concatenate %43, %44 in 1 : vector<8x24xf32>, vector<8x8xf32> -> vector<8x32xf32>
    %46 = arith.truncf %45 : vector<8x32xf32> to vector<8x32xbf16>
    %c128 = arith.constant 128 : index
    %c0_14 = arith.constant 0 : index
    %47 = vector.load %arg1[%c128, %c0_14] : memref<432x128xbf16, #tpu.memory_space<vmem>>, vector<32x128xbf16>
    %cst_15 = arith.constant dense<0.000000e+00> : vector<8x128xf32>
    %48 = tpu.matmul %46, %47, %cst_15 {dimension_numbers = #tpu.dot_dimension_numbers<[1], [0], [0], [1], [0, 0, 1, 1], [], []>} : vector<8x32xbf16>, vector<32x128xbf16>, vector<8x128xf32> -> vector<8x128xf32>
    %49 = vector.extract_strided_slice %1 {offsets = [3, 0], sizes = [1, 128], strides = [1, 1]} : vector<16x128xf32> to vector<1x128xf32>
    %50 = vector.broadcast %49 : vector<1x128xf32> to vector<8x128xf32>
    %51 = arith.addf %48, %50 : vector<8x128xf32>
    %52 = vector.extract_strided_slice %51 {offsets = [0, 0], sizes = [8, 64], strides = [1, 1]} : vector<8x128xf32> to vector<8x64xf32>
    %53 = arith.addf %52, %17 : vector<8x64xf32>
    %cst_16 = arith.constant 0.000000e+00 : f32
    %54 = vector.broadcast %cst_16 : f32 to vector<8x64xf32>
    %55 = arith.cmpf ogt, %53, %54 : vector<8x64xf32>
    %cst_17 = arith.constant 0.00999999977 : f32
    %56 = vector.broadcast %cst_17 : f32 to vector<8x64xf32>
    %57 = arith.mulf %56, %53 : vector<8x64xf32>
    %58 = arith.select %55, %53, %57 : vector<8x64xi1>, vector<8x64xf32>
    %59 = vector.extract_strided_slice %51 {offsets = [0, 64], sizes = [8, 64], strides = [1, 1]} : vector<8x128xf32> to vector<8x64xf32>
    %cst_18 = arith.constant 0.000000e+00 : f32
    %60 = vector.broadcast %cst_18 : f32 to vector<8x64xf32>
    %61 = arith.cmpf ogt, %59, %60 : vector<8x64xf32>
    %cst_19 = arith.constant 0.00999999977 : f32
    %62 = vector.broadcast %cst_19 : f32 to vector<8x64xf32>
    %63 = arith.mulf %62, %59 : vector<8x64xf32>
    %64 = arith.select %61, %59, %63 : vector<8x64xi1>, vector<8x64xf32>
    %65 = arith.truncf %58 : vector<8x64xf32> to vector<8x64xbf16>
    %c160 = arith.constant 160 : index
    %c0_20 = arith.constant 0 : index
    %66 = vector.load %arg1[%c160, %c0_20] : memref<432x128xbf16, #tpu.memory_space<vmem>>, vector<64x128xbf16>
    %cst_21 = arith.constant dense<0.000000e+00> : vector<8x128xf32>
    %67 = tpu.matmul %65, %66, %cst_21 {dimension_numbers = #tpu.dot_dimension_numbers<[1], [0], [0], [1], [0, 0, 1, 1], [], []>} : vector<8x64xbf16>, vector<64x128xbf16>, vector<8x128xf32> -> vector<8x128xf32>
    %68 = vector.extract_strided_slice %1 {offsets = [4, 0], sizes = [1, 128], strides = [1, 1]} : vector<16x128xf32> to vector<1x128xf32>
    %69 = vector.broadcast %68 : vector<1x128xf32> to vector<8x128xf32>
    %70 = arith.addf %67, %69 : vector<8x128xf32>
    %cst_22 = arith.constant 0.000000e+00 : f32
    %71 = vector.broadcast %cst_22 : f32 to vector<8x128xf32>
    %72 = arith.cmpf ogt, %70, %71 : vector<8x128xf32>
    %cst_23 = arith.constant 0.00999999977 : f32
    %73 = vector.broadcast %cst_23 : f32 to vector<8x128xf32>
    %74 = arith.mulf %73, %70 : vector<8x128xf32>
    %75 = arith.select %72, %70, %74 : vector<8x128xi1>, vector<8x128xf32>
    %76 = vector.extract_strided_slice %75 {offsets = [0, 0], sizes = [8, 64], strides = [1, 1]} : vector<8x128xf32> to vector<8x64xf32>
    %77 = arith.truncf %76 : vector<8x64xf32> to vector<8x64xbf16>
    %c224 = arith.constant 224 : index
    %c0_24 = arith.constant 0 : index
    %78 = vector.load %arg1[%c224, %c0_24] : memref<432x128xbf16, #tpu.memory_space<vmem>>, vector<64x128xbf16>
    %cst_25 = arith.constant dense<0.000000e+00> : vector<8x128xf32>
    %79 = tpu.matmul %77, %78, %cst_25 {dimension_numbers = #tpu.dot_dimension_numbers<[1], [0], [0], [1], [0, 0, 1, 1], [], []>} : vector<8x64xbf16>, vector<64x128xbf16>, vector<8x128xf32> -> vector<8x128xf32>
    %80 = vector.extract_strided_slice %1 {offsets = [5, 0], sizes = [1, 128], strides = [1, 1]} : vector<16x128xf32> to vector<1x128xf32>
    %81 = vector.broadcast %80 : vector<1x128xf32> to vector<8x128xf32>
    %82 = arith.addf %79, %81 : vector<8x128xf32>
    %83 = vector.extract_strided_slice %82 {offsets = [0, 0], sizes = [8, 4], strides = [1, 1]} : vector<8x128xf32> to vector<8x4xf32>
    %84 = vector.extract_strided_slice %82 {offsets = [0, 4], sizes = [8, 4], strides = [1, 1]} : vector<8x128xf32> to vector<8x4xf32>
    %cst_26 = arith.constant dense<0xFF800000> : vector<8xf32>
    %85 = vector.multi_reduction <maximumf>, %83, %cst_26 [1] : vector<8x4xf32> to vector<8xf32>
    %86 = vector.shape_cast %85 : vector<8xf32> to vector<8x1xf32>
    %87 = vector.broadcast %86 : vector<8x1xf32> to vector<8x4xf32>
    %88 = arith.subf %83, %87 : vector<8x4xf32>
    %89 = math.exp %88 : vector<8x4xf32>
    %cst_27 = arith.constant dense<0.000000e+00> : vector<8xf32>
    %90 = vector.multi_reduction <add>, %89, %cst_27 [1] : vector<8x4xf32> to vector<8xf32>
    %91 = vector.shape_cast %90 : vector<8xf32> to vector<8x1xf32>
    %92 = vector.broadcast %91 : vector<8x1xf32> to vector<8x4xf32>
    %93 = arith.divf %89, %92 : vector<8x4xf32>
    %cst_28 = arith.constant 1.000000e+00 : f32
    %94 = vector.broadcast %cst_28 : f32 to vector<8x4xf32>
    %95 = arith.mulf %94, %93 : vector<8x4xf32>
    %cst_29 = arith.constant 2.500000e-09 : f32
    %96 = vector.broadcast %cst_29 : f32 to vector<8x4xf32>
    %97 = arith.addf %96, %95 : vector<8x4xf32>
    %98 = arith.truncf %64 : vector<8x64xf32> to vector<8x64xbf16>
    %c288 = arith.constant 288 : index
    %c0_30 = arith.constant 0 : index
    %99 = vector.load %arg1[%c288, %c0_30] : memref<432x128xbf16, #tpu.memory_space<vmem>>, vector<64x128xbf16>
    %cst_31 = arith.constant dense<0.000000e+00> : vector<8x128xf32>
    %100 = tpu.matmul %98, %99, %cst_31 {dimension_numbers = #tpu.dot_dimension_numbers<[1], [0], [0], [1], [0, 0, 1, 1], [], []>} : vector<8x64xbf16>, vector<64x128xbf16>, vector<8x128xf32> -> vector<8x128xf32>
    %101 = vector.extract_strided_slice %1 {offsets = [6, 0], sizes = [1, 128], strides = [1, 1]} : vector<16x128xf32> to vector<1x128xf32>
    %102 = vector.broadcast %101 : vector<1x128xf32> to vector<8x128xf32>
    %103 = arith.addf %100, %102 : vector<8x128xf32>
    %cst_32 = arith.constant 0.000000e+00 : f32
    %104 = vector.broadcast %cst_32 : f32 to vector<8x128xf32>
    %105 = arith.cmpf ogt, %103, %104 : vector<8x128xf32>
    %cst_33 = arith.constant 0.00999999977 : f32
    %106 = vector.broadcast %cst_33 : f32 to vector<8x128xf32>
    %107 = arith.mulf %106, %103 : vector<8x128xf32>
    %108 = arith.select %105, %103, %107 : vector<8x128xi1>, vector<8x128xf32>
    %109 = vector.extract_strided_slice %108 {offsets = [0, 0], sizes = [8, 32], strides = [1, 1]} : vector<8x128xf32> to vector<8x32xf32>
    %110 = arith.truncf %109 : vector<8x32xf32> to vector<8x32xbf16>
    %c352 = arith.constant 352 : index
    %c0_34 = arith.constant 0 : index
    %111 = vector.load %arg1[%c352, %c0_34] : memref<432x128xbf16, #tpu.memory_space<vmem>>, vector<32x128xbf16>
    %cst_35 = arith.constant dense<0.000000e+00> : vector<8x128xf32>
    %112 = tpu.matmul %110, %111, %cst_35 {dimension_numbers = #tpu.dot_dimension_numbers<[1], [0], [0], [1], [0, 0, 1, 1], [], []>} : vector<8x32xbf16>, vector<32x128xbf16>, vector<8x128xf32> -> vector<8x128xf32>
    %113 = vector.extract_strided_slice %1 {offsets = [7, 0], sizes = [1, 128], strides = [1, 1]} : vector<16x128xf32> to vector<1x128xf32>
    %114 = vector.broadcast %113 : vector<1x128xf32> to vector<8x128xf32>
    %115 = arith.addf %112, %114 : vector<8x128xf32>
    %116 = vector.extract_strided_slice %108 {offsets = [0, 32], sizes = [8, 32], strides = [1, 1]} : vector<8x128xf32> to vector<8x32xf32>
    %117 = arith.truncf %116 : vector<8x32xf32> to vector<8x32xbf16>
    %c384 = arith.constant 384 : index
    %c0_36 = arith.constant 0 : index
    %118 = vector.load %arg1[%c384, %c0_36] : memref<432x128xbf16, #tpu.memory_space<vmem>>, vector<32x128xbf16>
    %cst_37 = arith.constant dense<0.000000e+00> : vector<8x128xf32>
    %119 = tpu.matmul %117, %118, %cst_37 {dimension_numbers = #tpu.dot_dimension_numbers<[1], [0], [0], [1], [0, 0, 1, 1], [], []>} : vector<8x32xbf16>, vector<32x128xbf16>, vector<8x128xf32> -> vector<8x128xf32>
    %120 = vector.extract_strided_slice %1 {offsets = [8, 0], sizes = [1, 128], strides = [1, 1]} : vector<16x128xf32> to vector<1x128xf32>
    %121 = vector.broadcast %120 : vector<1x128xf32> to vector<8x128xf32>
    %122 = arith.addf %119, %121 : vector<8x128xf32>
    %123 = vector.extract_strided_slice %1 {offsets = [9, 0], sizes = [1, 64], strides = [1, 1]} : vector<16x128xf32> to vector<1x64xf32>
    %124 = vector.extract_strided_slice %1 {offsets = [10, 0], sizes = [1, 64], strides = [1, 1]} : vector<16x128xf32> to vector<1x64xf32>
    %cst_38 = arith.constant 1.000000e+00 : f32
    %125 = vector.broadcast %cst_38 : f32 to vector<1x64xf32>
    %126 = arith.addf %125, %124 : vector<1x64xf32>
    %127 = vector.extract_strided_slice %115 {offsets = [0, 0], sizes = [8, 64], strides = [1, 1]} : vector<8x128xf32> to vector<8x64xf32>
    %128 = arith.subf %3, %127 : vector<8x64xf32>
    %129 = arith.mulf %128, %128 : vector<8x64xf32>
    %cst_39 = arith.constant 5.000000e-01 : f32
    %130 = vector.broadcast %cst_39 : f32 to vector<8x64xf32>
    %131 = arith.mulf %130, %129 : vector<8x64xf32>
    %132 = vector.broadcast %126 : vector<1x64xf32> to vector<8x64xf32>
    %133 = arith.mulf %131, %132 : vector<8x64xf32>
    %134 = vector.broadcast %123 : vector<1x64xf32> to vector<8x64xf32>
    %135 = arith.addf %133, %134 : vector<8x64xf32>
    %cst_40 = arith.constant 0.918938517 : f32
    %136 = vector.broadcast %cst_40 : f32 to vector<8x64xf32>
    %137 = arith.addf %135, %136 : vector<8x64xf32>
    %cst_41 = arith.constant dense<0.000000e+00> : vector<8xf32>
    %138 = vector.multi_reduction <add>, %137, %cst_41 [1] : vector<8x64xf32> to vector<8xf32>
    %139 = vector.shape_cast %138 : vector<8xf32> to vector<8x1xf32>
    %140 = vector.extract_strided_slice %35 {offsets = [0, 0], sizes = [8, 8], strides = [1, 1]} : vector<8x128xf32> to vector<8x8xf32>
    %141 = vector.extract_strided_slice %35 {offsets = [0, 24], sizes = [8, 8], strides = [1, 1]} : vector<8x128xf32> to vector<8x8xf32>
    %cst_42 = arith.constant 1.000000e+00 : f32
    %142 = vector.broadcast %cst_42 : f32 to vector<8x8xf32>
    %143 = arith.addf %142, %141 : vector<8x8xf32>
    %144 = arith.mulf %140, %140 : vector<8x8xf32>
    %145 = arith.subf %143, %144 : vector<8x8xf32>
    %146 = math.exp %141 : vector<8x8xf32>
    %147 = arith.subf %145, %146 : vector<8x8xf32>
    %cst_43 = arith.constant -5.000000e-01 : f32
    %148 = vector.broadcast %cst_43 : f32 to vector<8x8xf32>
    %149 = arith.mulf %148, %147 : vector<8x8xf32>
    %cst_44 = arith.constant dense<0.000000e+00> : vector<8xf32>
    %150 = vector.multi_reduction <add>, %149, %cst_44 [1] : vector<8x8xf32> to vector<8xf32>
    %151 = vector.shape_cast %150 : vector<8xf32> to vector<8x1xf32>
    %cst_45 = arith.constant 1.000000e+00 : f32
    %152 = vector.broadcast %cst_45 : f32 to vector<8x1xf32>
    %153 = arith.mulf %152, %151 : vector<8x1xf32>
    %154 = vector.extract_strided_slice %35 {offsets = [0, 8], sizes = [8, 16], strides = [1, 1]} : vector<8x128xf32> to vector<8x16xf32>
    %155 = vector.extract_strided_slice %35 {offsets = [0, 32], sizes = [8, 16], strides = [1, 1]} : vector<8x128xf32> to vector<8x16xf32>
    %156 = tpu.concatenate %154, %154, %154, %154 in 1 : vector<8x16xf32>, vector<8x16xf32>, vector<8x16xf32>, vector<8x16xf32> -> vector<8x64xf32>
    %157 = tpu.concatenate %155, %155, %155, %155 in 1 : vector<8x16xf32>, vector<8x16xf32>, vector<8x16xf32>, vector<8x16xf32> -> vector<8x64xf32>
    %158 = vector.extract_strided_slice %122 {offsets = [0, 0], sizes = [8, 64], strides = [1, 1]} : vector<8x128xf32> to vector<8x64xf32>
    %159 = vector.extract_strided_slice %122 {offsets = [0, 64], sizes = [8, 64], strides = [1, 1]} : vector<8x128xf32> to vector<8x64xf32>
    %cst_46 = arith.constant -1.000000e+00 : f32
    %160 = vector.broadcast %cst_46 : f32 to vector<8x64xf32>
    %161 = arith.addf %160, %159 : vector<8x64xf32>
    %162 = arith.subf %161, %157 : vector<8x64xf32>
    %163 = math.exp %157 : vector<8x64xf32>
    %164 = arith.subf %156, %158 : vector<8x64xf32>
    %165 = arith.mulf %164, %164 : vector<8x64xf32>
    %166 = arith.addf %163, %165 : vector<8x64xf32>
    %cst_47 = arith.constant 0.000000e+00 : f32
    %167 = vector.broadcast %cst_47 : f32 to vector<8x64xf32>
    %168 = arith.subf %167, %159 : vector<8x64xf32>
    %169 = math.exp %168 : vector<8x64xf32>
    %170 = arith.mulf %166, %169 : vector<8x64xf32>
    %171 = arith.addf %162, %170 : vector<8x64xf32>
    %cst_48 = arith.constant 5.000000e-01 : f32
    %172 = vector.broadcast %cst_48 : f32 to vector<8x64xf32>
    %173 = arith.mulf %172, %171 : vector<8x64xf32>
    %174 = vector.extract_strided_slice %173 {offsets = [0, 0], sizes = [8, 16], strides = [1, 1]} : vector<8x64xf32> to vector<8x16xf32>
    %cst_49 = arith.constant dense<0.000000e+00> : vector<8xf32>
    %175 = vector.multi_reduction <add>, %174, %cst_49 [1] : vector<8x16xf32> to vector<8xf32>
    %176 = vector.shape_cast %175 : vector<8xf32> to vector<8x1xf32>
    %177 = vector.extract_strided_slice %173 {offsets = [0, 16], sizes = [8, 16], strides = [1, 1]} : vector<8x64xf32> to vector<8x16xf32>
    %cst_50 = arith.constant dense<0.000000e+00> : vector<8xf32>
    %178 = vector.multi_reduction <add>, %177, %cst_50 [1] : vector<8x16xf32> to vector<8xf32>
    %179 = vector.shape_cast %178 : vector<8xf32> to vector<8x1xf32>
    %180 = vector.extract_strided_slice %173 {offsets = [0, 32], sizes = [8, 16], strides = [1, 1]} : vector<8x64xf32> to vector<8x16xf32>
    %cst_51 = arith.constant dense<0.000000e+00> : vector<8xf32>
    %181 = vector.multi_reduction <add>, %180, %cst_51 [1] : vector<8x16xf32> to vector<8xf32>
    %182 = vector.shape_cast %181 : vector<8xf32> to vector<8x1xf32>
    %183 = vector.extract_strided_slice %173 {offsets = [0, 48], sizes = [8, 16], strides = [1, 1]} : vector<8x64xf32> to vector<8x16xf32>
    %cst_52 = arith.constant dense<0.000000e+00> : vector<8xf32>
    %184 = vector.multi_reduction <add>, %183, %cst_52 [1] : vector<8x16xf32> to vector<8xf32>
    %185 = vector.shape_cast %184 : vector<8xf32> to vector<8x1xf32>
    %186 = tpu.concatenate %176, %179, %182, %185 in 1 : vector<8x1xf32>, vector<8x1xf32>, vector<8x1xf32>, vector<8x1xf32> -> vector<8x4xf32>
    %187 = arith.mulf %97, %186 : vector<8x4xf32>
    %cst_53 = arith.constant dense<0.000000e+00> : vector<8xf32>
    %188 = vector.multi_reduction <add>, %187, %cst_53 [1] : vector<8x4xf32> to vector<8xf32>
    %189 = vector.shape_cast %188 : vector<8xf32> to vector<8x1xf32>
    %cst_54 = arith.constant 1.000000e+00 : f32
    %190 = vector.broadcast %cst_54 : f32 to vector<8x1xf32>
    %191 = arith.mulf %190, %189 : vector<8x1xf32>
    %cst_55 = arith.constant dense<0xFF800000> : vector<8xf32>
    %192 = vector.multi_reduction <maximumf>, %97, %cst_55 [1] : vector<8x4xf32> to vector<8xf32>
    %193 = vector.shape_cast %192 : vector<8xf32> to vector<8x1xf32>
    %cst_56 = arith.constant 0.000000e+00 : f32
    %194 = vector.broadcast %cst_56 : f32 to vector<8x1xf32>
    %195 = arith.subf %194, %193 : vector<8x1xf32>
    %cst_57 = arith.constant 0.000000e+00 : f32
    %196 = vector.broadcast %cst_57 : f32 to vector<8x44xf32>
    %197 = tpu.concatenate %36, %43, %97, %84, %139, %191, %153, %195, %196 in 1 : vector<8x48xf32>, vector<8x24xf32>, vector<8x4xf32>, vector<8x4xf32>, vector<8x1xf32>, vector<8x1xf32>, vector<8x1xf32>, vector<8x1xf32>, vector<8x44xf32> -> vector<8x128xf32>
    %198 = tpu.concatenate %197, %115, %122 in 1 : vector<8x128xf32>, vector<8x128xf32>, vector<8x128xf32> -> vector<8x384xf32>
    %c0_58 = arith.constant 0 : index
    %c0_59 = arith.constant 0 : index
    %199 = vector.load %arg2[%c0_58, %c0_59] : memref<8x384xf32, #tpu.memory_space<vmem>>, vector<8x384xf32>
    tpu.vector_store %arg2[%c0_58, %c0_59], %198 {strides = array<i32>} : memref<8x384xf32, #tpu.memory_space<vmem>>, vector<8x384xf32>,
    return
  }
}

</mosaic_0001>

<bundles_post_ra>
// kernel: forward.5
= control target key start
LH: loop header
LB: loop body
LE: loop exit
PB: predicated region body
PF: predicated region fallthrough
CT: control target
= control target key end

     0   :  { %vm51_vm0 = vcmask 523264   ;;  %vm89_vm2 = vcmask 261120   ;;  %s785_s28 = smov 40   ;;  %s786_s3 = smov 64   ;;  %vm156_vm4 = vcmask 195584   ;;  %vm502_vm9 = vcmask 130048   ;;  %s1004_s1 = inlined_call_operand.vmem [shape: bf16[432,128], index: 1, kind: input, shape index: {}]   ;;  %s1005_s0 = inlined_call_operand.vmem [shape: f32[8,128], index: 0, kind: input, shape index: {}]   ;;  %s1006_s2 = inlined_call_operand.vmem [shape: f32[8,384], index: 2, kind: output, shape index: {}]  }
   0x1   :  { %v733_v0 = vld [vmem:[%s1004_s1 + $0x18] sm:$0xff]  ;;  %v732_v1 = vld [vmem:[%s1004_s1 + $0x10] sm:$0xff]  ;;  %v731_v2 = vld [vmem:[%s1004_s1 + $0x8] sm:$0xff]  ;;  %s787_s4 = smov 112   ;;  %s788_s5 = smov 8   ;;  %vm505_vm10 = vcmask 392192  }
   0x2   :  { %59 = vmatpush.bf16.msra.mxu0 %v733_v0  ;;  %v730_v3 = vld [vmem:[%s1004_s1] sm:$0xff]  ;;  %v735_v6 = vld [vmem:[%s1004_s1 + $0x28] sm:$0xff]  ;;  %v841_v8 = vld [vmem:[%s1004_s1 + $0xd0] sm:$0xff]   ;;  %s789_s16 = smov 96   ;;  %s790_s17 = smov 16   ;;  %vm306_vm11 = vcmask 31744  }
   0x3   :  { %v827_v4 = vld [vmem:[%s1005_s0] sm:$0xff]  ;;  %99 = vmatpush.bf16.msra.mxu1 %v735_v6  ;;  %v844_v9 = vunpack.c.l.bf16 %v841_v8  ;;  %v737_v17 = vld [vmem:[%s1004_s1 + $0x38] sm:$0xff]  ;;  %v736_v18 = vld [vmem:[%s1004_s1 + $0x30] sm:$0xff]  ;;  %s791_s18 = smov 24   ;;  %s793_s21 = smov 32  }
   0x4   :  { %v17_v5 = vpack.c.bf16 %v827_v4, %v827_v4  ;;  %v734_v7 = vld [vmem:[%s1004_s1 + $0x20] sm:$0xff]  ;;  %136 = vmatpush.bf16.msra.mxu2 %v737_v17  ;;  %v739_v33 = vld [vmem:[%s1004_s1 + $0x48] sm:$0xff]  ;;  %v749_v49 = vld [vmem:[%s1004_s1 + $0x98] sm:$0xff]  ;;  %s795_s22 = smov 48  }
   0x5   :  { %v26_v10 = vperm.slane %v844_v9, 0  ;;  %v76_v19 = vperm.slane %v844_v9, 1  ;;  %v114_v26 = vperm.slane %v844_v9, 2  ;;  %185 = vmatpush.bf16.msra.mxu3 %v739_v33  ;;  %v738_v36 = vld [vmem:[%s1004_s1 + $0x40] sm:$0xff]  ;;  %v163_v41 = vperm.slane %v844_v9, 3  ;;  %v751_v43 = vld [vmem:[%s1004_s1 + $0xa8] sm:$0xff] }
   0x6   :  { %60 = vmatpush.bf16.msra.mxu0 %v732_v1  ;;  %v750_v45 = vld [vmem:[%s1004_s1 + $0xa0] sm:$0xff]  ;;  %v748_v51 = vld [vmem:[%s1004_s1 + $0x90] sm:$0xff]  ;;  %v743_v52 = vld [vmem:[%s1004_s1 + $0x68] sm:$0xff] }
   0x7   :  { %100 = vmatpush.bf16.msra.mxu1 %v734_v7  ;;  %v742_v53 = vld [vmem:[%s1004_s1 + $0x60] sm:$0xff]  ;;  %v741_v54 = vld [vmem:[%s1004_s1 + $0x58] sm:$0xff]  ;;  %v740_v55 = vld [vmem:[%s1004_s1 + $0x50] sm:$0xff] }
   0x8   :  { %137 = vmatpush.bf16.msra.mxu2 %v736_v18  ;;  %v753_v62 = vld [vmem:[%s1004_s1 + $0xb8] sm:$0xff]  ;;  %v747_v63 = vld [vmem:[%s1004_s1 + $0x88] sm:$0xff]  ;;  %v752_v0 = vld [vmem:[%s1004_s1 + $0xb0] sm:$0xff] }
   0x9   :  { %186 = vmatpush.bf16.msra.mxu3 %v738_v36  ;;  %v746_v1 = vld [vmem:[%s1004_s1 + $0x80] sm:$0xff]  ;;  %v755_v7 = vld [vmem:[%s1004_s1 + $0xc8] sm:$0xff] }
   0xa   :  { %61 = vmatpush.bf16.msra.mxu0 %v731_v2  ;;  %v745_v2 = vld [vmem:[%s1004_s1 + $0x78] sm:$0xff] }
   0xb   :  { %244 = vmatpush.bf16.msrb.mxu1 %v743_v52 }
   0xc   :  { %297 = vmatpush.bf16.msrb.mxu2 %v747_v63 }
   0xd   :  { %376 = vmatpush.bf16.msrb.mxu3 %v751_v43 }
   0xe   :  { %62 = vmatpush.bf16.msra.mxu0 %v730_v3  ;;  %v744_v3 = vld [vmem:[%s1004_s1 + $0x70] sm:$0xff] }
   0xf   :  { %245 = vmatpush.bf16.msrb.mxu1 %v742_v53 }
  0x10   :  { %298 = vmatpush.bf16.msrb.mxu2 %v746_v1 }
  0x11   :  { %633 = vmatmul.msk.bf16.vlgmr.msra.gmra.mxu0 %vm51_vm0, %v17_v5  ;;  %377 = vmatpush.bf16.msrb.mxu3 %v750_v45  ;;  %v341_v5 = vperm.slane %v844_v9, 6 }
  0x12   :  { %415 = vmatpush.bf16.msrb.mxu0 %v753_v62 }
  0x13   :  { %246 = vmatpush.bf16.msrb.mxu1 %v741_v54 }
  0x14   :  { %299 = vmatpush.bf16.msrb.mxu2 %v745_v2 }
  0x15   :  { %378 = vmatpush.bf16.msrb.mxu3 %v749_v49 }
  0x16   :  { %416 = vmatpush.bf16.msrb.mxu0 %v752_v0  ;;  %v265_v0 = vperm.slane %v844_v9, 5 }
  0x17   :  { %247 = vmatpush.bf16.msrb.mxu1 %v740_v55 }
  0x18   :  { %300 = vmatpush.bf16.msrb.mxu2 %v744_v3 }
  0x19   :  { %379 = vmatpush.bf16.msrb.mxu3 %v748_v51 }
  0x8e   :  { %v64_v11 = vpop.f32.mrf.mxu0 }
  0x8f   :  { %v847_v12 = vadd.f32 %v64_v11, %v26_v10  ;;  %v754_v11 = vld [vmem:[%s1004_s1 + $0xc0] sm:$0xff]  ;;  %s792_s1 = smov 120  }
  0x91   :  { %v69_v13 = vmul.f32 0.01, %v847_v12  ;;  %vm68_vm1 = vcmp.gt.f32.partialorder %v847_v12, 0.0 }
  0x93   :  { %v70_v14 = vsel %vm68_vm1, %v847_v12, %v69_v13  ;;  %vm569_vm1 = vcmask 7168  }
  0x94   :  { %v71_v15 = vpack.c.bf16 %v70_v14, %v70_v14 }
  0x96   :  { %v66_v16 = vpop.f32.mrf.mxu0  ;;  %642 = vmatmul.msk.bf16.vlgmr.msra.gmra.mxu1 %vm89_vm2, %v71_v15  ;;  %v212_v15 = vperm.slane %v844_v9, 4 }
  0x97   :  { %451 = vmatpush.bf16.msra.mxu1 %v755_v7 }
  0x9b   :  { %452 = vmatpush.bf16.msra.mxu1 %v754_v11 }
 0x113   :  { %v102_v20 = vpop.f32.mrf.mxu1 }
 0x114   :  { %v103_v21 = vadd.f32 %v102_v20, %v76_v19 }
 0x116   :  { %vm106_vm3 = vcmp.gt.f32.partialorder %v103_v21, 0.0  ;;  %v107_v22 = vmul.f32 0.01, %v103_v21 }
 0x118   :  { %v108_v23 = vsel %vm106_vm3, %v103_v21, %v107_v22  ;;  %vm573_vm3 = vcmask 23552  }
 0x119   :  { %v109_v24 = vpack.c.bf16 %v108_v23, %v108_v23 }
 0x11b   :  { %v104_v25 = vpop.f32.mrf.mxu1  ;;  %651 = vmatmul.msk.bf16.vlgmr.msra.gmra.mxu2 %vm89_vm2, %v109_v24 }
 0x19e   :  { %v139_v27 = vpop.f32.mrf.mxu2 }
 0x19f   :  { %v862_v28 = vadd.f32 %v139_v27, %v114_v26 }
 0x1a1   :  { %v143_v29 = vmul.f32 0.5, %v862_v28 }
 0x1a3   :  { %v144_v30 = vmul.f32 1.442695, %v143_v29 }
 0x1a5   :  { %773 = vpow2.f32 %v144_v30 }
 0x1a6   :  { %v141_v31 = vpop.f32.mrf.mxu2 }
 0x1a7   :  { %v393_v31 = vperm.slane %v844_v9, 7 }
 0x1ab   :  { %v774_v32 = vpop.eup %773 }
 0x1ac   :  { %147 = vrot.lane.b32.xlu0 %v774_v32, %s785_s28  ;;  %v759_v32 = vunpack.c.h.bf16 %v841_v8 }
 0x1ae   :  { %v426_v49 = vperm.slane %v759_v32, 0 }
 0x21e   :  { %v148_v34 = vpop.permute.xlu0 %147 }
 0x21f   :  { %v150_v35 = vmul.f32 %v148_v34, %v827_v4 }
 0x221   :  { %152 = vrot.lane.b32.xlu0 %v150_v35, %s786_s3  ;;  %v458_v35 = vadd.f32 1.0, %v759_v32 }
 0x229   :  { %510 = vrot.lane.b32.xlu0 %v862_v28, %s787_s4 }
 0x231   :  { %493 = vrot.lane.b32.xlu0 %v862_v28, %s788_s5 }
 0x293   :  { %v153_v37 = vpop.permute.xlu0 %152 }
 0x294   :  { %v877_v38 = vadd.f32 %v153_v37, %v862_v28 }
 0x296   :  { %v157_v39 = vsel %vm156_vm4, %v877_v38, 0.0  ;;  %vm596_vm4 = vcmask 588800  }
 0x297   :  { %v158_v40 = vpack.c.bf16 %v157_v39, %v157_v39  ;;  %v462_v39 = vperm.slane %v458_v35, 2 }
 0x299   :  { %660 = vmatmul.msk.bf16.vlgmr.msra.gmra.mxu3 %vm89_vm2, %v158_v40 }
 0x29b   :  { %v511_v24 = vpop.permute.xlu0 %510 }
 0x31c   :  { %v188_v42 = vpop.f32.mrf.mxu3 }
 0x31d   :  { %v189_v44 = vadd.f32 %v188_v42, %v163_v41  ;;  %v464_v41 = vperm.slane %v759_v32, 1 }
 0x31f   :  { %vm200_vm5 = vcmp.gt.f32.partialorder %v189_v44, 0.0  ;;  %v201_v46 = vmul.f32 0.01, %v189_v44 }
 0x321   :  { %v202_v47 = vsel %vm200_vm5, %v189_v44, %v201_v46  ;;  %vm598_vm5 = vcmask 621568  }
 0x322   :  { %v332_v48 = vpack.c.bf16 %v202_v47, %v202_v47 }
 0x324   :  { %v190_v50 = vpop.f32.mrf.mxu3  ;;  %343 = vrot.lane.b32.xlu1 %v332_v48, %s786_s3  ;;  %v494_v48 = vpop.permute.xlu0 %493 }
 0x32c   :  { %193 = vrot.lane.b32.xlu1 %v847_v12, %s789_s16 }
 0x334   :  { %513 = vrot.lane.b32.xlu1 %v862_v28, %s790_s17 }
 0x33c   :  { %496 = vrot.lane.b32.xlu1 %v862_v28, %s791_s18 }
 0x396   :  { %v344_v56 = vpop.permute.xlu1 %343 }
 0x397   :  { %711 = vmatmul.msk.bf16.vlgmr.msrb.gmra.mxu3 %vm51_vm0, %v344_v56 }
 0x39e   :  { %v194_v57 = vpop.permute.xlu1 %193 }
 0x39f   :  { %v196_v58 = vadd.f32 %v194_v57, %v189_v44 }
 0x3a1   :  { %vm197_vm6 = vcmp.gt.f32.partialorder %v196_v58, 0.0  ;;  %v198_v59 = vmul.f32 0.01, %v196_v58 }
 0x3a3   :  { %v199_v60 = vsel %vm197_vm6, %v196_v58, %v198_v59  ;;  %vm600_vm6 = vcmask 654336  }
 0x3a4   :  { %v203_v61 = vpack.c.bf16 %v199_v60, %v199_v60 }
 0x3a6   :  { %677 = vmatmul.msk.bf16.vlgmr.msrb.gmra.mxu1 %vm51_vm0, %v203_v61  ;;  %v514_v27 = vpop.permute.xlu1 %513 }
 0x3ae   :  { %v497_v51 = vpop.permute.xlu1 %496 }
 0x41a   :  { %v381_v6 = vpop.f32.mrf.mxu3 }
 0x41b   :  { %v382_v10 = vadd.f32 %v381_v6, %v341_v5 }
 0x41d   :  { %v386_v12 = vmul.f32 0.01, %v382_v10  ;;  %vm385_vm7 = vcmp.gt.f32.partialorder %v382_v10, 0.0 }
 0x41f   :  { %v387_v13 = vsel %vm385_vm7, %v382_v10, %v386_v12  ;;  %vm602_vm7 = vcmask 662528  }
 0x420   :  { %v388_v14 = vpack.c.bf16 %v387_v13, %v387_v13 }
 0x422   :  { %v383_v16 = vpop.f32.mrf.mxu3  ;;  %428 = vrot.lane.b32.xlu2 %v388_v14, %s789_s16  ;;  %720 = vmatmul.msk.bf16.vlgmr.msrb.gmra.mxu0 %vm89_vm2, %v388_v14  ;;  %v471_v14 = vmul.f32 %v862_v28, %v862_v28 }
 0x423   :  { %v249_v17 = vpop.f32.mrf.mxu1 }
 0x424   :  { %v250_v18 = vadd.f32 %v249_v17, %v212_v15 }
 0x426   :  { %vm253_vm8 = vcmp.gt.f32.partialorder %v250_v18, 0.0  ;;  %v254_v19 = vmul.f32 0.01, %v250_v18 }
 0x428   :  { %v255_v20 = vsel %vm253_vm8, %v250_v18, %v254_v19  ;;  %vm604_vm8 = vcmask 670720  }
 0x429   :  { %v256_v21 = vpack.c.bf16 %v255_v20, %v255_v20 }
 0x42a   :  { %507 = vrot.lane.b32.xlu2 %v862_v28, %s789_s16 }
 0x42b   :  { %v251_v22 = vpop.f32.mrf.mxu1  ;;  %694 = vmatmul.msk.bf16.vlgmr.msrb.gmra.mxu2 %vm51_vm0, %v256_v21 }
 0x42c   :  { %v477_v22 = vmul.f32 1.442695, %v862_v28 }
 0x432   :  { %490 = vrot.lane.b32.xlu2 %v862_v28, %s792_s1 }
 0x43a   :  { %499 = vrot.lane.b32.xlu2 %v862_v28, %s785_s28 }
 0x47c   :  { %v429_v23 = vpop.permute.xlu2 %428 }
 0x47d   :  { %729 = vmatmul.msk.bf16.vlgmr.msra.gmra.mxu1 %vm89_vm2, %v429_v23  ;;  %v470_v23 = vadd.f32 1.0, %v862_v28 }
 0x484   :  { %v508_v25 = vpop.permute.xlu2 %507 }
 0x485   :  { %v516_v26 = vsel %vm502_vm9, %v508_v25, %v511_v24 }
 0x486   :  { %v517_v29 = vsel %vm89_vm2, %v516_v26, %v862_v28 }
 0x487   :  { %v518_v30 = vsel %vm505_vm10, %v517_v29, %v514_v27 }
 0x488   :  { %521 = vrot.lane.b32.xlu1 %v518_v30, %s786_s3  ;;  %v525_v8 = vmul.f32 1.442695, %v518_v30 }
 0x48a   :  { %775 = vpow2.f32 %v525_v8 }
 0x48c   :  { %v491_v47 = vpop.permute.xlu2 %490 }
 0x48d   :  { %v503_v50 = vsel %vm502_vm9, %v491_v47, %v494_v48 }
 0x48e   :  { %v504_v53 = vsel %vm89_vm2, %v503_v50, %v497_v51  ;;  %vm571_vm2 = vcmask 15360  }
 0x490   :  { %v776_v60 = vpop.eup %775 }
 0x49f   :  { %v418_v33 = vpop.f32.mrf.mxu0 }
 0x4a0   :  { %v419_v34 = vadd.f32 %v418_v33, %v393_v31 }
 0x4a2   :  { %v459_v36 = vsub.f32 %v827_v4, %v419_v34  ;;  %611 = vst [vmem:[%s1006_s2 + $0x8] sm:$0xff] %v419_v34  ;;  %v500_v4 = vpop.permute.xlu2 %499 }
 0x4a3   :  { %v506_v55 = vsel %vm505_vm10, %v504_v53, %v500_v4 }
 0x4a4   :  { %v460_v37 = vmul.f32 %v459_v36, %v459_v36 }
 0x4a6   :  { %v461_v40 = vmul.f32 0.5, %v460_v37 }
 0x4a7   :  { %v420_v42 = vpop.f32.mrf.mxu0 }
 0x4a8   :  { %v463_v43 = vmul.f32 %v462_v39, %v461_v40 }
 0x4aa   :  { %v465_v44 = vadd.f32 %v464_v41, %v463_v43 }
 0x4ac   :  { %v466_v6 = vadd.f32 0.9189385, %v465_v44 }
 0x4ae   :  { %v302_v45 = vpop.f32.mrf.mxu2  ;;  %v467_v10 = vsel %vm51_vm0, %v466_v6, 0.0  ;;  %vm485_vm0 = vcmask 64512  }
 0x4af   :  { %v969_v1 = vadd.f32 %v302_v45, %v265_v0 }
 0x4b1   :  { %v307_v2 = vsel %vm306_vm11, %v969_v1, -inf }
 0x4b6   :  { %v304_v46 = vpop.f32.mrf.mxu2 }
 0x4fa   :  { %v454_v52 = vpop.f32.mrf.mxu1  ;;  %v522_v16 = vpop.permute.xlu1 %521 }
 0x4fb   :  { %v455_v54 = vadd.f32 %v454_v52, %v426_v49 }
 0x4fd   :  { %v530_v56 = vsub.f32 0.0, %v455_v54  ;;  %612 = vst [vmem:[%s1006_s2 + $0x10] sm:$0xff] %v455_v54  ;;  %v527_v57 = vsub.f32 %v506_v55, %v455_v54  ;;  %v519_v15 = vadd.f32 -1.0, %v455_v54 }
 0x4ff   :  { %v531_v58 = vmul.f32 1.442695, %v530_v56  ;;  %v528_v59 = vmul.f32 %v527_v57, %v527_v57  ;;  %v524_v17 = vsub.f32 %v519_v15, %v522_v16 }
 0x501   :  { %777 = vpow2.f32 %v531_v58  ;;  %v529_v61 = vadd.f32 %v776_v60, %v528_v59 }
 0x502   :  { %v456_v62 = vpop.f32.mrf.mxu1 }
 0x507   :  { %v778_v63 = vpop.eup %777 }
 0x508   :  { %534 = vrot.lane.b32.xlu0 %v778_v63, %s786_s3 }
 0x532   :  { %308 = vmax.xlane.f32.xlu0 %v307_v2 }
 0x57a   :  { %v535_v3 = vpop.permute.xlu0 %534 }
 0x57b   :  { %v537_v5 = vmul.f32 %v535_v3, %v529_v61 }
 0x57d   :  { %539 = vrot.lane.b32.xlu2 %v537_v5, %s786_s3 }
 0x5a5   :  { %v309_v7 = vpop.xlane.xlu0 %308 }
 0x5a6   :  { %v310_v11 = vsub.f32 %v969_v1, %v309_v7  ;;  %468 = vadd.xlane.f32.xlu2 %v467_v10 }
 0x5a8   :  { %v311_v12 = vmul.f32 1.442695, %v310_v11 }
 0x5aa   :  { %779 = vpow2.f32 %v311_v12 }
 0x5ab   :  { %781 = vpow2.f32 %v477_v22 }
 0x5b0   :  { %v780_v9 = vpop.eup %779 }
 0x5b1   :  { %v313_v13 = vsel %vm306_vm11, %v780_v9, 0.0  ;;  %v782_v26 = vpop.eup %781 }
 0x5b2   :  { %314 = vadd.xlane.f32.xlu1 %v313_v13 }
 0x5be   :  { %473 = vrot.lane.b32.xlu2 %v471_v14, %s791_s18  ;;  %s794_s18 = smov 104  }
 0x5d7   :  { %v540_v18 = vpop.permute.xlu2 %539 }
 0x5d8   :  { %v542_v19 = vadd.f32 %v540_v18, %v524_v17 }
 0x5da   :  { %v543_v20 = vmul.f32 0.5, %v542_v19 }
 0x5dc   :  { %557 = vrot.lane.b32.xlu2 %v543_v20, %s793_s21 }
 0x619   :  { %v980_v21 = vpop.xlane.xlu2 %468 }
 0x621   :  { %v474_v24 = vpop.permute.xlu2 %473 }
 0x622   :  { %v476_v25 = vsub.f32 %v470_v23, %v474_v24 }
 0x624   :  { %v479_v27 = vsub.f32 %v476_v25, %v782_v26 }
 0x625   :  { %v315_v30 = vpop.xlane.xlu1 %314 }
 0x626   :  { %v480_v29 = vmul.f32 -0.5, %v479_v27  ;;  %783 = vrcp.f32 %v315_v30  ;;  %v327_v36 = vand.u32 2147483648, %v315_v30  ;;  %vm321_vm13 = vweird.f32 %v315_v30 }
 0x627   :  { %v325_v37 = vand.u32 2147483647, %v315_v30 }
 0x628   :  { %482 = vrot.lane.b32.xlu0 %v480_v29, %s794_s18  ;;  %v328_v40 = vor.u32 1.1754944e-38, %v327_v36 }
 0x629   :  { %vm326_vm15 = vcmp.eq.f32.partialorder %v325_v37, 8.507059e+37 }
 0x62c   :  { %v784_v31 = vpop.eup %783 }
 0x62d   :  { %v317_v32 = vmul.f32 %v784_v31, %v315_v30  ;;  %vm322_vm12 = vweird.f32 %v784_v31 }
 0x62e   :  { %vm323_vm14 = vmor %vm321_vm13, %vm322_vm12 }
 0x62f   :  { %v318_v33 = vsub.f32 1.0, %v317_v32 }
 0x630   :  { %551 = vrot.lane.b32.xlu0 %v543_v20, %s795_s22 }
 0x631   :  { %v319_v34 = vmul.f32 %v784_v31, %v318_v33 }
 0x633   :  { %v320_v35 = vadd.f32 %v784_v31, %v319_v34 }
 0x635   :  { %v324_v39 = vsel %vm323_vm14, %v784_v31, %v320_v35 }
 0x636   :  { %v558_v41 = vpop.permute.xlu2 %557  ;;  %v329_v42 = vsel %vm326_vm15, %v328_v40, %v324_v39 }
 0x637   :  { %v560_v43 = vsel %vm502_vm9, %v558_v41, 0.0  ;;  %v330_v44 = vmul.f32 %v780_v9, %v329_v42 }
 0x638   :  { %563 = vrot.lane.b32.xlu0 %v543_v20, %s790_s17  ;;  %s796_s17 = smov 72  }
 0x639   :  { %v331_v45 = vadd.f32 2.5e-09, %v330_v44 }
 0x63b   :  { %v579_v46 = vsel %vm306_vm11, %v331_v45, -inf }
 0x662   :  { %561 = vadd.xlane.f32.xlu0 %v560_v43 }
 0x66a   :  { %580 = vmax.xlane.f32.xlu0 %v579_v46 }
 0x67e   :  { %592 = vrot.lane.b32.xlu0 %v969_v1, %s796_s17 }
 0x69a   :  { %v483_v47 = vpop.permute.xlu0 %482 }
 0x69b   :  { %v486_v8 = vsel %vm485_vm0, %v483_v47, 0.0 }
 0x69c   :  { %487 = vadd.xlane.f32.xlu1 %v486_v8 }
 0x6a2   :  { %v552_v48 = vpop.permute.xlu0 %551 }
 0x6a3   :  { %v554_v49 = vsel %vm502_vm9, %v552_v48, 0.0 }
 0x6aa   :  { %v564_v52 = vpop.permute.xlu0 %563 }
 0x6ab   :  { %v566_v53 = vsel %vm502_vm9, %v564_v52, 0.0 }
 0x6b5   :  { %545 = vrot.lane.b32.xlu1 %v543_v20, %s786_s3 }
 0x6d5   :  { %v562_v57 = vpop.xlane.xlu0 %561 }
 0x6dd   :  { %v581_v0 = vpop.xlane.xlu0 %580 }
 0x6de   :  { %v582_v10 = vsub.f32 0.0, %v581_v0 }
 0x6df   :  { %555 = vadd.xlane.f32.xlu1 %v554_v49 }
 0x6f0   :  { %v593_v3 = vpop.permute.xlu0 %592 }
 0x70f   :  { %v488_v50 = vpop.xlane.xlu1 %487 }
 0x727   :  { %v546_v4 = vpop.permute.xlu1 %545 }
 0x728   :  { %v548_v51 = vsel %vm502_vm9, %v546_v4, 0.0  ;;  %vm606_vm9 = vcmask 678912  }
 0x729   :  { %549 = vadd.xlane.f32.xlu2 %v548_v51 }
 0x731   :  { %567 = vadd.xlane.f32.xlu2 %v566_v53 }
 0x749   :  { %584 = vrot.lane.b32.xlu2 %v877_v38, %s795_s22 }
 0x752   :  { %v556_v55 = vpop.xlane.xlu1 %555 }
 0x79c   :  { %v550_v54 = vpop.xlane.xlu2 %549 }
 0x79d   :  { %v570_v56 = vsel %vm569_vm1, %v550_v54, %v556_v55 }
 0x79e   :  { %v572_v59 = vsel %vm571_vm2, %v570_v56, %v562_v57 }
 0x7a4   :  { %v568_v58 = vpop.xlane.xlu2 %567 }
 0x7a5   :  { %v574_v60 = vsel %vm573_vm3, %v572_v59, %v568_v58 }
 0x7a6   :  { %v575_v61 = vmul.f32 %v574_v60, %v331_v45 }
 0x7a8   :  { %v576_v62 = vsel %vm306_vm11, %v575_v61, 0.0  ;;  %vm608_vm11 = vcmask 687104  }
 0x7a9   :  { %577 = vadd.xlane.f32.xlu1 %v576_v62 }
 0x7ac   :  { %v585_v1 = vpop.permute.xlu2 %584 }
 0x7ad   :  { %v595_v38 = vsel %vm505_vm10, %v862_v28, %v585_v1 }
 0x7c2   :  { %588 = vrot.lane.b32.xlu1 %v331_v45, %s796_s17 }
 0x81c   :  { %v578_v63 = vpop.xlane.xlu1 %577 }
 0x834   :  { %v589_v2 = vpop.permute.xlu1 %588 }
 0x835   :  { %v597_v5 = vsel %vm596_vm4, %v595_v38, %v589_v2 }
 0x836   :  { %v599_v6 = vsel %vm598_vm5, %v597_v5, %v593_v3 }
 0x837   :  { %v601_v7 = vsel %vm600_vm6, %v599_v6, %v980_v21 }
 0x838   :  { %v603_v11 = vsel %vm602_vm7, %v601_v7, %v578_v63 }
 0x839   :  { %v605_v12 = vsel %vm604_vm8, %v603_v11, %v488_v50 }
 0x83a   :  { %v607_v9 = vsel %vm606_vm9, %v605_v12, %v582_v10 }
 0x83b   :  { %v609_v13 = vsel %vm608_vm11, %v607_v9, 0.0 }
 0x83c   :  { %610 = vst [vmem:[%s1006_s2] sm:$0xff] %v609_v13 }

</bundles_post_ra>
